<compile_context>
chip_gen: v6e
topology: v6e:2x2x1
jax: 0.10.0
libtpu: 0.0.40
codegen_flags: <defaults>
</compile_context>

<pallas_src>
import numpy as np

import jax
import jax.numpy as jnp
from jax import lax
from jax.experimental import pallas as pl
from jax.experimental.pallas import tpu as pltpu

LANE = 128
SUB = 8


def _round_up(x, m):
    return ((x + m - 1) // m) * m


# ----------------------------- fused Pallas kernel ---------------------------
def _make_tree_forward(L_pad, seq_pad, e_pad, c_pad, tile, num_levels,
                       total_rows):
    """Build (and jit) the fused single-invocation forward for one tree shape."""
    n_lvl = max(1, num_levels)

    def kernel(leaf_ref, emb_w_ref, emb_b_ref, wl_ref, wr_ref, cb_ref,
               pw_ref, pb_ref, sel_l_ref, sel_r_ref, out_ref, state_ref):
        # Zero the state slab so padded / not-yet-written rows can never leak
        # NaNs through the one-hot gather matmuls.
        state_ref[...] = jnp.zeros_like(state_ref)

        # Level 0: all leaves in one MXU tile  h = relu(X @ W_emb + b).
        h0 = jnp.dot(leaf_ref[...], emb_w_ref[...],
                     preferred_element_type=jnp.float32)
        state_ref[pl.ds(0, L_pad), :] = jnp.maximum(h0 + emb_b_ref[...], 0.0)

        # Internal levels (wavefront): gather child rows via one-hot select
        # matmuls, then concat-free combine h = relu(h_l@W_l + h_r@W_r + b).
        def level_body(lvl, carry):
            st = state_ref[...]                                   # [rows, e]
            hl = jnp.dot(sel_l_ref[lvl], st,
                         preferred_element_type=jnp.float32)      # [tile, e]
            hr = jnp.dot(sel_r_ref[lvl], st,
                         preferred_element_type=jnp.float32)
            h = jnp.dot(hl, wl_ref[...], preferred_element_type=jnp.float32)
            h = h + jnp.dot(hr, wr_ref[...], preferred_element_type=jnp.float32)
            off = pl.multiple_of(L_pad + lvl * tile, SUB)
            state_ref[pl.ds(off, tile), :] = jnp.maximum(h + cb_ref[...], 0.0)
            return carry

        if num_levels > 0:
            lax.fori_loop(0, num_levels, level_body, 0, unroll=True)

        # Project every node row once; the host selects the root-flagged rows.
        logits = jnp.dot(state_ref[...], pw_ref[...],
                         preferred_element_type=jnp.float32) + pb_ref[...]
        out_ref[...] = logits

    const2 = lambda i: (0, 0)
    const3 = lambda i: (0, 0, 0)

    grid_spec = pltpu.PrefetchScalarGridSpec(
        num_scalar_prefetch=0,
        grid=(1,),
        in_specs=[
            pl.BlockSpec((L_pad, seq_pad), const2),            # leaf_x
            pl.BlockSpec((seq_pad, e_pad), const2),            # emb_w
            pl.BlockSpec((1, e_pad), const2),                  # emb_b
            pl.BlockSpec((e_pad, e_pad), const2),              # W_l
            pl.BlockSpec((e_pad, e_pad), const2),              # W_r
            pl.BlockSpec((1, e_pad), const2),                  # comb_b
            pl.BlockSpec((e_pad, c_pad), const2),              # proj_w
            pl.BlockSpec((1, c_pad), const2),                  # proj_b
            pl.BlockSpec((n_lvl, tile, total_rows), const3),   # sel_l
            pl.BlockSpec((n_lvl, tile, total_rows), const3),   # sel_r
        ],
        out_specs=pl.BlockSpec((total_rows, c_pad), const2),
        scratch_shapes=[pltpu.VMEM((total_rows, e_pad), jnp.float32)],
    )

    flops = (2 * L_pad * seq_pad * e_pad
             + num_levels * (2 * 2 * tile * total_rows * e_pad
                             + 2 * 2 * tile * e_pad * e_pad)
             + 2 * total_rows * e_pad * c_pad)
    bytes_accessed = 4 * (L_pad * seq_pad + seq_pad * e_pad + 2 * e_pad * e_pad
                          + e_pad * c_pad + 2 * e_pad + c_pad
                          + 2 * n_lvl * tile * total_rows
                          + total_rows * c_pad)

    call = pl.pallas_call(
        kernel,
        out_shape=jax.ShapeDtypeStruct((total_rows, c_pad), jnp.float32),
        grid_spec=grid_spec,
        compiler_params=pltpu.CompilerParams(
            dimension_semantics=("arbitrary",)),
        cost_estimate=pl.CostEstimate(flops=int(flops), transcendentals=0,
                                      bytes_accessed=int(bytes_accessed)),
    )
    return jax.jit(call)


_FWD_CACHE = {}


def _get_tree_forward(L_pad, seq_pad, e_pad, c_pad, tile, num_levels,
                      total_rows):
    key = (L_pad, seq_pad, e_pad, c_pad, tile, num_levels, total_rows)
    fn = _FWD_CACHE.get(key)
    if fn is None:
        fn = _make_tree_forward(*key)
        _FWD_CACHE[key] = fn
    return fn


# ------------------------------ tree plumbing --------------------------------
class Node:
    """Minimal binary-tree node matching the interface used by RNN.traverse."""

    def __init__(self, seq=None, children=None, label=0, is_root=False):
        self.seq = seq
        self.children = children or []
        self.label = label
        self._is_root = is_root

    def is_leaf(self):
        return len(self.children) == 0

    def is_root(self):
        return self._is_root

    def get_children(self):
        return self.children


class RNNPallas:
    """Recursive tree RNN; the whole tree forward runs inside one fused Pallas
    kernel invocation.  Tree -> level schedule conversion (data-dependent
    structure) stays in Python and is cached per tree."""

    def __init__(self, sequenceSize, embedSize=100, numClasses=2, key=None):
        if key is None:
            key = jax.random.PRNGKey(0)
        ks = jax.random.split(key, 6)

        self.sequenceSize = sequenceSize
        self.embedSize = embedSize
        self.numClasses = numClasses
        self.seq_pad = _round_up(sequenceSize, LANE)
        self.e_pad = _round_up(embedSize, LANE)
        self.c_pad = _round_up(numClasses, LANE)

        def init_linear(kw, kb, fan_in, fan_out):
            bound = 1.0 / float(np.sqrt(fan_in))
            w = jax.random.uniform(kw, (fan_in, fan_out), jnp.float32,
                                   -bound, bound)
            b = jax.random.uniform(kb, (1, fan_out), jnp.float32,
                                   -bound, bound)
            return w, b

        emb_w, emb_b = init_linear(ks[0], ks[1], sequenceSize, embedSize)
        comb_w, comb_b = init_linear(ks[2], ks[3], 2 * embedSize, embedSize)
        proj_w, proj_b = init_linear(ks[4], ks[5], embedSize, numClasses)

        # Unpadded copies kept only for the pure-JAX reference check.
        self._raw = dict(emb_w=emb_w, emb_b=emb_b,
                         wl=comb_w[:embedSize], wr=comb_w[embedSize:],
                         comb_b=comb_b, proj_w=proj_w, proj_b=proj_b)

        def pad2(a, rows, cols):
            z = jnp.zeros((rows, cols), jnp.float32)
            return z.at[:a.shape[0], :a.shape[1]].set(a)

        # 128-lane padded, VMEM-resident parameters (zero padding is exact).
        self.emb_w = pad2(emb_w, self.seq_pad, self.e_pad)
        self.emb_b = pad2(emb_b, 1, self.e_pad)
        self.wl = pad2(comb_w[:embedSize], self.e_pad, self.e_pad)
        self.wr = pad2(comb_w[embedSize:], self.e_pad, self.e_pad)
        self.comb_b = pad2(comb_b, 1, self.e_pad)
        self.proj_w = pad2(proj_w, self.e_pad, self.c_pad)
        self.proj_b = pad2(proj_b, 1, self.c_pad)

        self.nodeProbList = []
        self.labelList = []
        self._sched_cache = {}

    # Build a level (wavefront) schedule: leaves first, then internal nodes
    # grouped by level; per level a one-hot selection matrix gathers children.
    def _build_schedule(self, root):
        post, leaf_rows = [], []

        def visit(node):
            if node.is_leaf():
                entry = dict(leaf=True, leaf_row=len(leaf_rows), level=0,
                             left=-1, right=-1)
                leaf_rows.append(np.asarray(node.seq, np.float32).reshape(-1))
            else:
                ch = node.get_children()
                li = visit(ch[0])
                ri = visit(ch[1])
                entry = dict(leaf=False,
                             level=1 + max(post[li]["level"],
                                           post[ri]["level"]),
                             left=li, right=ri)
            entry["flag_root"] = bool(node.is_root())
            entry["label"] = int(node.label)
            post.append(entry)
            return len(post) - 1

        visit(root)

        num_leaves = len(leaf_rows)
        L_pad = max(SUB, _round_up(num_leaves, SUB))
        num_levels = max(e["level"] for e in post)
        if num_levels > 0:
            counts = [0] * (num_levels + 1)
            for e in post:
                counts[e["level"]] += 1
            tile = max(SUB, _round_up(max(counts[1:]), SUB))
        else:
            tile = SUB
        total_rows = L_pad + num_levels * tile

        # Assign state-slab rows: leaves first, then a tile-aligned band per level.
        slot = [0] * (num_levels + 1)
        for e in post:
            if e["leaf"]:
                e["row"] = e["leaf_row"]
            else:
                l = e["level"]
                e["row"] = L_pad + (l - 1) * tile + slot[l]
                slot[l] += 1

        n_lvl = max(1, num_levels)
        sel_l = np.zeros((n_lvl, tile, total_rows), np.float32)
        sel_r = np.zeros((n_lvl, tile, total_rows), np.float32)
        for e in post:
            if not e["leaf"]:
                l = e["level"]
                s = e["row"] - L_pad - (l - 1) * tile
                sel_l[l - 1, s, post[e["left"]]["row"]] = 1.0
                sel_r[l - 1, s, post[e["right"]]["row"]] = 1.0

        leaf_x = np.zeros((L_pad, self.seq_pad), np.float32)
        for r, s in enumerate(leaf_rows):
            leaf_x[r, : s.shape[0]] = s

        flag_rows = np.asarray([e["row"] for e in post if e["flag_root"]],
                               np.int32)
        labels = np.asarray([e["label"] for e in post if e["flag_root"]],
                            np.int32)

        return dict(leaf_x=jnp.asarray(leaf_x),
                    sel_l=jnp.asarray(sel_l), sel_r=jnp.asarray(sel_r),
                    L_pad=L_pad, tile=tile, num_levels=num_levels,
                    total_rows=total_rows, flag_rows=flag_rows,
                    labels=jnp.asarray(labels))

    def forward(self, tree):
        cached = self._sched_cache.get(id(tree))
        if cached is None or cached[0] is not tree:
            cached = (tree, self._build_schedule(tree))
            self._sched_cache[id(tree)] = cached
        sched = cached[1]

        fwd = _get_tree_forward(sched["L_pad"], self.seq_pad, self.e_pad,
                                self.c_pad, sched["tile"],
                                sched["num_levels"], sched["total_rows"])
        out_pad = fwd(sched["leaf_x"], self.emb_w, self.emb_b,
                      self.wl, self.wr, self.comb_b,
                      self.proj_w, self.proj_b,
                      sched["sel_l"], sched["sel_r"])

        # Per-node logits for every node flagged as root (traversal order).
        logits = out_pad[sched["flag_rows"], : self.numClasses]
        self.nodeProbList = [logits]
        self.labelList = sched["labels"]
        return logits

    # Pure-JAX reference (unpadded weights, HIGHEST-precision matmuls).
    def reference_forward(self, tree):
        p = self._raw
        hp = jax.lax.Precision.HIGHEST
        outs = []

        def visit(node):
            if node.is_leaf():
                x = jnp.asarray(np.asarray(node.seq, np.float32))[None, :]
                h = jax.nn.relu(jnp.dot(x, p["emb_w"], precision=hp)
                                + p["emb_b"])
            else:
                ch = node.get_children()
                l = visit(ch[0])
                r = visit(ch[1])
                h = jax.nn.relu(jnp.dot(l, p["wl"], precision=hp)
                                + jnp.dot(r, p["wr"], precision=hp)
                                + p["comb_b"])
            if node.is_root():
                outs.append(jnp.dot(h, p["proj_w"], precision=hp)
                            + p["proj_b"])
            return h

        visit(tree)
        return jnp.concatenate(outs, axis=0)


# ---------------------------------- main -------------------------------------
if __name__ == "__main__":
    sequenceSize = 16
    embedSize = 32
    numClasses = 2

    key = jax.random.PRNGKey(0)
    kmodel, kl1, kl2, kl3 = jax.random.split(key, 4)

    model = RNNPallas(sequenceSize, embedSize, numClasses, key=kmodel)

    # Small deterministic binary tree:  root(leaf1, internal(leaf2, leaf3))
    leaf1 = Node(seq=np.asarray(jax.random.normal(kl1, (sequenceSize,),
                                                  jnp.float32)))
    leaf2 = Node(seq=np.asarray(jax.random.normal(kl2, (sequenceSize,),
                                                  jnp.float32)))
    leaf3 = Node(seq=np.asarray(jax.random.normal(kl3, (sequenceSize,),
                                                  jnp.float32)))
    inner = Node(children=[leaf2, leaf3])
    root = Node(children=[leaf1, inner], label=1, is_root=True)

    out = model.forward(root)
    out = jax.block_until_ready(out)

    assert out.shape == (1, numClasses)
    assert model.labelList.shape == (1,)

    # Numerical check against a pure-JAX HIGHEST-precision reference.
    ref = np.asarray(model.reference_forward(root))
    np.testing.assert_allclose(np.asarray(out), ref, rtol=1e-3, atol=1e-3)

    # Second call exercises the schedule / compiled-forward caches.
    out2 = jax.block_until_ready(model.forward(root))
    np.testing.assert_allclose(np.asarray(out2), np.asarray(out))

    # TODO(synk): training-side utilities (getLoss/evaluate, cross-entropy,
    # grad clipping) are host-level and not part of the fused forward kernel.
    print("KERNEL_OK")
</pallas_src>

<mosaic_0001>
module attributes {stable_mosaic.version = 11 : i64} {
  func.func @kernel(%arg0: i32, %arg1: memref<8x128xf32, #tpu.memory_space<vmem>>, %arg2: memref<128x128xf32, #tpu.memory_space<vmem>>, %arg3: memref<1x128xf32, #tpu.memory_space<vmem>>, %arg4: memref<128x128xf32, #tpu.memory_space<vmem>>, %arg5: memref<128x128xf32, #tpu.memory_space<vmem>>, %arg6: memref<1x128xf32, #tpu.memory_space<vmem>>, %arg7: memref<128x128xf32, #tpu.memory_space<vmem>>, %arg8: memref<1x128xf32, #tpu.memory_space<vmem>>, %arg9: memref<2x8x24xf32, #tpu.memory_space<vmem>>, %arg10: memref<2x8x24xf32, #tpu.memory_space<vmem>>, %arg11: memref<24x128xf32, #tpu.memory_space<vmem>>, %arg12: memref<24x128xf32, #tpu.memory_space<vmem>>) attributes {dimension_semantics = [#tpu.dimension_semantics<arbitrary>], iteration_bounds = array<i64: 1>, scalar_prefetch = 0 : i64, scratch_operands = 1 : i64, tpu.core_type = #tpu.core_type<tc>, window_params = [{pipeline_mode = #tpu.pipeline_mode<synchronous>, transform_indices = @transform_0, window_bounds = array<i64: 8, 128>}, {pipeline_mode = #tpu.pipeline_mode<synchronous>, transform_indices = @transform_1, window_bounds = array<i64: 128, 128>}, {pipeline_mode = #tpu.pipeline_mode<synchronous>, transform_indices = @transform_2, window_bounds = array<i64: 1, 128>}, {pipeline_mode = #tpu.pipeline_mode<synchronous>, transform_indices = @transform_3, window_bounds = array<i64: 128, 128>}, {pipeline_mode = #tpu.pipeline_mode<synchronous>, transform_indices = @transform_4, window_bounds = array<i64: 128, 128>}, {pipeline_mode = #tpu.pipeline_mode<synchronous>, transform_indices = @transform_5, window_bounds = array<i64: 1, 128>}, {pipeline_mode = #tpu.pipeline_mode<synchronous>, transform_indices = @transform_6, window_bounds = array<i64: 128, 128>}, {pipeline_mode = #tpu.pipeline_mode<synchronous>, transform_indices = @transform_7, window_bounds = array<i64: 1, 128>}, {pipeline_mode = #tpu.pipeline_mode<synchronous>, transform_indices = @transform_8, window_bounds = array<i64: 2, 8, 24>}, {pipeline_mode = #tpu.pipeline_mode<synchronous>, transform_indices = @transform_9, window_bounds = array<i64: 2, 8, 24>}, {pipeline_mode = #tpu.pipeline_mode<synchronous>, transform_indices = @transform_10, window_bounds = array<i64: 24, 128>}]} {
    %cst = arith.constant 0.000000e+00 : f32
    %0 = vector.broadcast %cst : f32 to vector<24x128xf32>
    %c0 = arith.constant 0 : index
    %c0_0 = arith.constant 0 : index
    %1 = vector.load %arg12[%c0, %c0_0] : memref<24x128xf32, #tpu.memory_space<vmem>>, vector<24x128xf32>
    tpu.vector_store %arg12[%c0, %c0_0], %0 {strides = array<i32>} : memref<24x128xf32, #tpu.memory_space<vmem>>, vector<24x128xf32>,
    %c0_1 = arith.constant 0 : index
    %c0_2 = arith.constant 0 : index
    %2 = vector.load %arg1[%c0_1, %c0_2] : memref<8x128xf32, #tpu.memory_space<vmem>>, vector<8x128xf32>
    %c0_3 = arith.constant 0 : index
    %c0_4 = arith.constant 0 : index
    %3 = vector.load %arg2[%c0_3, %c0_4] : memref<128x128xf32, #tpu.memory_space<vmem>>, vector<128x128xf32>
    %cst_5 = arith.constant dense<0.000000e+00> : vector<8x128xf32>
    %4 = tpu.matmul %2, %3, %cst_5 {dimension_numbers = #tpu.dot_dimension_numbers<[1], [0], [0], [1], [0, 0, 1, 1], [], []>} : vector<8x128xf32>, vector<128x128xf32>, vector<8x128xf32> -> vector<8x128xf32>
    %c0_6 = arith.constant 0 : index
    %c0_7 = arith.constant 0 : index
    %5 = vector.load %arg3[%c0_6, %c0_7] : memref<1x128xf32, #tpu.memory_space<vmem>>, vector<1x128xf32>
    %6 = vector.broadcast %5 : vector<1x128xf32> to vector<8x128xf32>
    %7 = arith.addf %4, %6 : vector<8x128xf32>
    %cst_8 = arith.constant 0.000000e+00 : f32
    %8 = vector.broadcast %cst_8 : f32 to vector<8x128xf32>
    %9 = arith.maximumf %7, %8 : vector<8x128xf32>
    %c0_9 = arith.constant 0 : index
    %c0_10 = arith.constant 0 : index
    %10 = vector.load %arg12[%c0_9, %c0_10] : memref<24x128xf32, #tpu.memory_space<vmem>>, vector<8x128xf32>
    tpu.vector_store %arg12[%c0_9, %c0_10], %9 {strides = array<i32>} : memref<24x128xf32, #tpu.memory_space<vmem>>, vector<8x128xf32>,
    %c0_i32 = arith.constant 0 : i32
    %c0_11 = arith.constant 0 : index
    %c0_12 = arith.constant 0 : index
    %11 = vector.load %arg12[%c0_11, %c0_12] : memref<24x128xf32, #tpu.memory_space<vmem>>, vector<24x128xf32>
    %12 = arith.index_cast %c0_i32 : i32 to index
    %c0_13 = arith.constant 0 : index
    %c0_14 = arith.constant 0 : index
    %13 = vector.load %arg9[%12, %c0_13, %c0_14] : memref<2x8x24xf32, #tpu.memory_space<vmem>>, vector<1x8x24xf32>
    %14 = vector.shape_cast %13 : vector<1x8x24xf32> to vector<8x24xf32>
    %cst_15 = arith.constant dense<0.000000e+00> : vector<8x128xf32>
    %15 = tpu.matmul %14, %11, %cst_15 {dimension_numbers = #tpu.dot_dimension_numbers<[1], [0], [0], [1], [0, 0, 1, 1], [], []>} : vector<8x24xf32>, vector<24x128xf32>, vector<8x128xf32> -> vector<8x128xf32>
    %16 = arith.index_cast %c0_i32 : i32 to index
    %c0_16 = arith.constant 0 : index
    %c0_17 = arith.constant 0 : index
    %17 = vector.load %arg10[%16, %c0_16, %c0_17] : memref<2x8x24xf32, #tpu.memory_space<vmem>>, vector<1x8x24xf32>
    %18 = vector.shape_cast %17 : vector<1x8x24xf32> to vector<8x24xf32>
    %cst_18 = arith.constant dense<0.000000e+00> : vector<8x128xf32>
    %19 = tpu.matmul %18, %11, %cst_18 {dimension_numbers = #tpu.dot_dimension_numbers<[1], [0], [0], [1], [0, 0, 1, 1], [], []>} : vector<8x24xf32>, vector<24x128xf32>, vector<8x128xf32> -> vector<8x128xf32>
    %c0_19 = arith.constant 0 : index
    %c0_20 = arith.constant 0 : index
    %20 = vector.load %arg4[%c0_19, %c0_20] : memref<128x128xf32, #tpu.memory_space<vmem>>, vector<128x128xf32>
    %cst_21 = arith.constant dense<0.000000e+00> : vector<8x128xf32>
    %21 = tpu.matmul %15, %20, %cst_21 {dimension_numbers = #tpu.dot_dimension_numbers<[1], [0], [0], [1], [0, 0, 1, 1], [], []>} : vector<8x128xf32>, vector<128x128xf32>, vector<8x128xf32> -> vector<8x128xf32>
    %c0_22 = arith.constant 0 : index
    %c0_23 = arith.constant 0 : index
    %22 = vector.load %arg5[%c0_22, %c0_23] : memref<128x128xf32, #tpu.memory_space<vmem>>, vector<128x128xf32>
    %cst_24 = arith.constant dense<0.000000e+00> : vector<8x128xf32>
    %23 = tpu.matmul %19, %22, %cst_24 {dimension_numbers = #tpu.dot_dimension_numbers<[1], [0], [0], [1], [0, 0, 1, 1], [], []>} : vector<8x128xf32>, vector<128x128xf32>, vector<8x128xf32> -> vector<8x128xf32>
    %24 = arith.addf %21, %23 : vector<8x128xf32>
    %c8_i32 = arith.constant 8 : i32
    %25 = arith.muli %c0_i32, %c8_i32 : i32
    %c8_i32_25 = arith.constant 8 : i32
    %26 = arith.addi %c8_i32_25, %25 : i32
    %27 = tpu.assume_multiple %26, 8 : i32
    %c0_26 = arith.constant 0 : index
    %c0_27 = arith.constant 0 : index
    %28 = vector.load %arg6[%c0_26, %c0_27] : memref<1x128xf32, #tpu.memory_space<vmem>>, vector<1x128xf32>
    %29 = vector.broadcast %28 : vector<1x128xf32> to vector<8x128xf32>
    %30 = arith.addf %24, %29 : vector<8x128xf32>
    %cst_28 = arith.constant 0.000000e+00 : f32
    %31 = vector.broadcast %cst_28 : f32 to vector<8x128xf32>
    %32 = arith.maximumf %30, %31 : vector<8x128xf32>
    %33 = arith.index_cast %27 : i32 to index
    %c0_29 = arith.constant 0 : index
    %34 = vector.load %arg12[%33, %c0_29] : memref<24x128xf32, #tpu.memory_space<vmem>>, vector<8x128xf32>
    tpu.vector_store %arg12[%33, %c0_29], %32 {strides = array<i32>} : memref<24x128xf32, #tpu.memory_space<vmem>>, vector<8x128xf32>,
    %c1_i32 = arith.constant 1 : i32
    %c0_30 = arith.constant 0 : index
    %c0_31 = arith.constant 0 : index
    %35 = vector.load %arg12[%c0_30, %c0_31] : memref<24x128xf32, #tpu.memory_space<vmem>>, vector<24x128xf32>
    %36 = arith.index_cast %c1_i32 : i32 to index
    %c0_32 = arith.constant 0 : index
    %c0_33 = arith.constant 0 : index
    %37 = vector.load %arg9[%36, %c0_32, %c0_33] : memref<2x8x24xf32, #tpu.memory_space<vmem>>, vector<1x8x24xf32>
    %38 = vector.shape_cast %37 : vector<1x8x24xf32> to vector<8x24xf32>
    %cst_34 = arith.constant dense<0.000000e+00> : vector<8x128xf32>
    %39 = tpu.matmul %38, %35, %cst_34 {dimension_numbers = #tpu.dot_dimension_numbers<[1], [0], [0], [1], [0, 0, 1, 1], [], []>} : vector<8x24xf32>, vector<24x128xf32>, vector<8x128xf32> -> vector<8x128xf32>
    %40 = arith.index_cast %c1_i32 : i32 to index
    %c0_35 = arith.constant 0 : index
    %c0_36 = arith.constant 0 : index
    %41 = vector.load %arg10[%40, %c0_35, %c0_36] : memref<2x8x24xf32, #tpu.memory_space<vmem>>, vector<1x8x24xf32>
    %42 = vector.shape_cast %41 : vector<1x8x24xf32> to vector<8x24xf32>
    %cst_37 = arith.constant dense<0.000000e+00> : vector<8x128xf32>
    %43 = tpu.matmul %42, %35, %cst_37 {dimension_numbers = #tpu.dot_dimension_numbers<[1], [0], [0], [1], [0, 0, 1, 1], [], []>} : vector<8x24xf32>, vector<24x128xf32>, vector<8x128xf32> -> vector<8x128xf32>
    %c0_38 = arith.constant 0 : index
    %c0_39 = arith.constant 0 : index
    %44 = vector.load %arg4[%c0_38, %c0_39] : memref<128x128xf32, #tpu.memory_space<vmem>>, vector<128x128xf32>
    %cst_40 = arith.constant dense<0.000000e+00> : vector<8x128xf32>
    %45 = tpu.matmul %39, %44, %cst_40 {dimension_numbers = #tpu.dot_dimension_numbers<[1], [0], [0], [1], [0, 0, 1, 1], [], []>} : vector<8x128xf32>, vector<128x128xf32>, vector<8x128xf32> -> vector<8x128xf32>
    %c0_41 = arith.constant 0 : index
    %c0_42 = arith.constant 0 : index
    %46 = vector.load %arg5[%c0_41, %c0_42] : memref<128x128xf32, #tpu.memory_space<vmem>>, vector<128x128xf32>
    %cst_43 = arith.constant dense<0.000000e+00> : vector<8x128xf32>
    %47 = tpu.matmul %43, %46, %cst_43 {dimension_numbers = #tpu.dot_dimension_numbers<[1], [0], [0], [1], [0, 0, 1, 1], [], []>} : vector<8x128xf32>, vector<128x128xf32>, vector<8x128xf32> -> vector<8x128xf32>
    %48 = arith.addf %45, %47 : vector<8x128xf32>
    %c8_i32_44 = arith.constant 8 : i32
    %49 = arith.muli %c1_i32, %c8_i32_44 : i32
    %c8_i32_45 = arith.constant 8 : i32
    %50 = arith.addi %c8_i32_45, %49 : i32
    %51 = tpu.assume_multiple %50, 8 : i32
    %c0_46 = arith.constant 0 : index
    %c0_47 = arith.constant 0 : index
    %52 = vector.load %arg6[%c0_46, %c0_47] : memref<1x128xf32, #tpu.memory_space<vmem>>, vector<1x128xf32>
    %53 = vector.broadcast %52 : vector<1x128xf32> to vector<8x128xf32>
    %54 = arith.addf %48, %53 : vector<8x128xf32>
    %cst_48 = arith.constant 0.000000e+00 : f32
    %55 = vector.broadcast %cst_48 : f32 to vector<8x128xf32>
    %56 = arith.maximumf %54, %55 : vector<8x128xf32>
    %57 = arith.index_cast %51 : i32 to index
    %c0_49 = arith.constant 0 : index
    %58 = vector.load %arg12[%57, %c0_49] : memref<24x128xf32, #tpu.memory_space<vmem>>, vector<8x128xf32>
    tpu.vector_store %arg12[%57, %c0_49], %56 {strides = array<i32>} : memref<24x128xf32, #tpu.memory_space<vmem>>, vector<8x128xf32>,
    %c2_i32 = arith.constant 2 : i32
    %c0_50 = arith.constant 0 : index
    %c0_51 = arith.constant 0 : index
    %59 = vector.load %arg12[%c0_50, %c0_51] : memref<24x128xf32, #tpu.memory_space<vmem>>, vector<24x128xf32>
    %c0_52 = arith.constant 0 : index
    %c0_53 = arith.constant 0 : index
    %60 = vector.load %arg7[%c0_52, %c0_53] : memref<128x128xf32, #tpu.memory_space<vmem>>, vector<128x128xf32>
    %cst_54 = arith.constant dense<0.000000e+00> : vector<24x128xf32>
    %61 = tpu.matmul %59, %60, %cst_54 {dimension_numbers = #tpu.dot_dimension_numbers<[1], [0], [0], [1], [0, 0, 1, 1], [], []>} : vector<24x128xf32>, vector<128x128xf32>, vector<24x128xf32> -> vector<24x128xf32>
    %c0_55 = arith.constant 0 : index
    %c0_56 = arith.constant 0 : index
    %62 = vector.load %arg8[%c0_55, %c0_56] : memref<1x128xf32, #tpu.memory_space<vmem>>, vector<1x128xf32>
    %63 = vector.broadcast %62 : vector<1x128xf32> to vector<24x128xf32>
    %64 = arith.addf %61, %63 : vector<24x128xf32>
    %c0_57 = arith.constant 0 : index
    %c0_58 = arith.constant 0 : index
    %65 = vector.load %arg11[%c0_57, %c0_58] : memref<24x128xf32, #tpu.memory_space<vmem>>, vector<24x128xf32>
    tpu.vector_store %arg11[%c0_57, %c0_58], %64 {strides = array<i32>} : memref<24x128xf32, #tpu.memory_space<vmem>>, vector<24x128xf32>,
    return
  }
  func.func @transform_0(%arg0: i32) -> (i32, i32) {
    %c0_i32 = arith.constant 0 : i32
    %c0_i32_0 = arith.constant 0 : i32
    %c0_i32_1 = arith.constant 0 : i32
    return %c0_i32, %c0_i32_0 : i32, i32
  }
  func.func @transform_1(%arg0: i32) -> (i32, i32) {
    %c0_i32 = arith.constant 0 : i32
    %c0_i32_0 = arith.constant 0 : i32
    %c0_i32_1 = arith.constant 0 : i32
    return %c0_i32, %c0_i32_0 : i32, i32
  }
  func.func @transform_2(%arg0: i32) -> (i32, i32) {
    %c0_i32 = arith.constant 0 : i32
    %c0_i32_0 = arith.constant 0 : i32
    %c0_i32_1 = arith.constant 0 : i32
    return %c0_i32, %c0_i32_0 : i32, i32
  }
  func.func @transform_3(%arg0: i32) -> (i32, i32) {
    %c0_i32 = arith.constant 0 : i32
    %c0_i32_0 = arith.constant 0 : i32
    %c0_i32_1 = arith.constant 0 : i32
    return %c0_i32, %c0_i32_0 : i32, i32
  }
  func.func @transform_4(%arg0: i32) -> (i32, i32) {
    %c0_i32 = arith.constant 0 : i32
    %c0_i32_0 = arith.constant 0 : i32
    %c0_i32_1 = arith.constant 0 : i32
    return %c0_i32, %c0_i32_0 : i32, i32
  }
  func.func @transform_5(%arg0: i32) -> (i32, i32) {
    %c0_i32 = arith.constant 0 : i32
    %c0_i32_0 = arith.constant 0 : i32
    %c0_i32_1 = arith.constant 0 : i32
    return %c0_i32, %c0_i32_0 : i32, i32
  }
  func.func @transform_6(%arg0: i32) -> (i32, i32) {
    %c0_i32 = arith.constant 0 : i32
    %c0_i32_0 = arith.constant 0 : i32
    %c0_i32_1 = arith.constant 0 : i32
    return %c0_i32, %c0_i32_0 : i32, i32
  }
  func.func @transform_7(%arg0: i32) -> (i32, i32) {
    %c0_i32 = arith.constant 0 : i32
    %c0_i32_0 = arith.constant 0 : i32
    %c0_i32_1 = arith.constant 0 : i32
    return %c0_i32, %c0_i32_0 : i32, i32
  }
  func.func @transform_8(%arg0: i32) -> (i32, i32, i32) {
    %c0_i32 = arith.constant 0 : i32
    %c0_i32_0 = arith.constant 0 : i32
    %c0_i32_1 = arith.constant 0 : i32
    %c0_i32_2 = arith.constant 0 : i32
    return %c0_i32, %c0_i32_0, %c0_i32_1 : i32, i32, i32
  }
  func.func @transform_9(%arg0: i32) -> (i32, i32, i32) {
    %c0_i32 = arith.constant 0 : i32
    %c0_i32_0 = arith.constant 0 : i32
    %c0_i32_1 = arith.constant 0 : i32
    %c0_i32_2 = arith.constant 0 : i32
    return %c0_i32, %c0_i32_0, %c0_i32_1 : i32, i32, i32
  }
  func.func @transform_10(%arg0: i32) -> (i32, i32) {
    %c0_i32 = arith.constant 0 : i32
    %c0_i32_0 = arith.constant 0 : i32
    %c0_i32_1 = arith.constant 0 : i32
    return %c0_i32, %c0_i32_0 : i32, i32
  }
}

</mosaic_0001>

<bundles_post_ra>
// kernel: tpu_custom_call.1
= control target key start
LH: loop header
LB: loop body
LE: loop exit
PB: predicated region body
PF: predicated region fallthrough
CT: control target
= control target key end

     0   :  { %15 = vsyncpa [#allocation4], 0  ;;  %s2036_s0 = inlined_call_operand.hbm [shape: f32[8,128], index: 0, kind: input, shape index: {}]   ;;  %s2037_s1 = inlined_call_operand.hbm [shape: f32[128,128], index: 1, kind: input, shape index: {}]   ;;  %s2038_s2 = inlined_call_operand.hbm [shape: f32[1,128], index: 2, kind: input, shape index: {}]   ;;  %s2039_s3 = inlined_call_operand.hbm [shape: f32[128,128], index: 3, kind: input, shape index: {}]   ;;  %s2040_s4 = inlined_call_operand.hbm [shape: f32[128,128], index: 4, kind: input, shape index: {}]   ;;  %s2041_s5 = inlined_call_operand.hbm [shape: f32[1,128], index: 5, kind: input, shape index: {}]   ;;  %s2042_s6 = inlined_call_operand.hbm [shape: f32[128,128], index: 6, kind: input, shape index: {}]   ;;  %s2043_s7 = inlined_call_operand.hbm [shape: f32[1,128], index: 7, kind: input, shape index: {}]   ;;  %s2044_s8 = inlined_call_operand.hbm [shape: f32[2,8,24], index: 8, kind: input, shape index: {}]   ;;  %s2045_s9 = inlined_call_operand.vmem [shape: f32[2,8,24], index: 9, kind: input, shape index: {}]   ;;  %s2046_s10 = inlined_call_operand.hbm [shape: f32[24,128], index: 10, kind: output, shape index: {}]  }
   0x1   :  { %16 = vsyncpa [#allocation7], 0 }
   0x2   :  { %17 = vsyncpa [#allocation10], 0 }
   0x3   :  { %18 = vsyncpa [#allocation13], 0 }
   0x4   :  { %19 = vsyncpa [#allocation16], 0 }
   0x5   :  { %20 = vsyncpa [#allocation5], 0  ;;  %s1639_s13 = smov [#allocation6]  }
   0x6   :  { %s36_s14 = sshll.u32 %s1639_s13, 4  ;;  %s37_s14 = int_to_ptr.vmem [resolvable:$true] %s36_s14 }
   0x7   :  { %s1435_s15 = scalar_lea.vmem %s37_s14, 2048  ;;  %p1440_p1 = scmp.lt.s32.totalorder %s37_s14, %s37_s14 }
   0x8   :  { %p1436_p0 = scmp.ne.s32.totalorder %s37_s14, %s1435_s15  ;;  %p1441_p2 = scmp.lt.s32.totalorder %s1435_s15, %s1435_s15 }
   0xa   :  { %p1442_p3 = por %p1441_p2, %p1440_p1 }
   0xc   :  { %p1443_p4 = pnand %p1442_p3, %p1436_p0 }
   0xe   :  { %1446 = shalt.err (!%p1443_p4)
}
   0xf   :  { %s1640_s16 = smov 128   ;;  %s1641_s17 = smov 8  }
  0x10   :  { %42 = dma.hbm_to_vmem [thread:$0]  %s2037_s1, 2048, %s37_s14, [#allocation7], %s1640_s16, %s1640_s16, %s1641_s17  }
  0x11   :  { %s1642_s20 = smov [#allocation9]   ;;  %s1643_s22 = smov [#allocation12]  }
  0x12   :  { %s58_s21 = sshll.u32 %s1642_s20, 4  ;;  %s83_s23 = sshll.u32 %s1643_s22, 4  ;;  %s59_s21 = int_to_ptr.vmem [resolvable:$true] %s58_s21  ;;  %s84_s23 = int_to_ptr.vmem [resolvable:$true] %s83_s23 }
  0x13   :  { %s1455_s24 = scalar_lea.vmem %s59_s21, 2048  ;;  %p1460_p6 = scmp.lt.s32.totalorder %s59_s21, %s59_s21 }
  0x14   :  { %p1456_p5 = scmp.ne.s32.totalorder %s59_s21, %s1455_s24  ;;  %p1461_p7 = scmp.lt.s32.totalorder %s1455_s24, %s1455_s24 }
  0x16   :  { %p1462_p8 = por %p1461_p7, %p1460_p6 }
  0x18   :  { %p1463_p9 = pnand %p1462_p8, %p1456_p5 }
  0x1a   :  { %1466 = shalt.err (!%p1463_p9)
}
  0x1b   :  { %64 = dma.hbm_to_vmem [thread:$0]  %s2039_s3, 2048, %s59_s21, [#allocation10], %s1640_s16, %s1640_s16, %s1641_s17  }
  0x1c   :  { %s1475_s1 = scalar_lea.vmem %s84_s23, 16  ;;  %s1479_s27 = scalar_lea.vmem %s84_s23, 32 }
  0x1d   :  { %p1476_p10 = scmp.ne.s32.totalorder %s84_s23, %s1475_s1  ;;  %p1480_p11 = scmp.lt.s32.totalorder %s84_s23, %s84_s23 }
  0x1e   :  { %p1481_p12 = scmp.lt.s32.totalorder %s1479_s27, %s1475_s1 }
  0x20   :  { %p1482_p13 = por %p1481_p12, %p1480_p11 }
  0x22   :  { %p1483_p0 = pnand %p1482_p13, %p1476_p10 }
  0x24   :  { %1486 = shalt.err (!%p1483_p0)
}
  0x25   :  { %86 = dma.hbm_to_vmem [thread:$0]  %s2041_s5, 16, %s84_s23, [#allocation13]  }
  0x26   :  { %s1644_s30 = smov [#allocation15]   ;;  %s1645_s12 = smov [#allocation3]  }
  0x27   :  { %s105_s11 = sshll.u32 %s1644_s30, 4  ;;  %s27_s13 = sshll.u32 %s1645_s12, 4  ;;  %s106_s11 = int_to_ptr.vmem [resolvable:$true] %s105_s11  ;;  %s28_s13 = int_to_ptr.vmem [resolvable:$true] %s27_s13 }
  0x28   :  { %s1495_s14 = scalar_lea.vmem %s106_s11, 16  ;;  %s1499_s3 = scalar_lea.vmem %s106_s11, 32 }
  0x29   :  { %p1496_p1 = scmp.ne.s32.totalorder %s106_s11, %s1495_s14  ;;  %p1500_p2 = scmp.lt.s32.totalorder %s106_s11, %s106_s11 }
  0x2a   :  { %p1501_p3 = scmp.lt.s32.totalorder %s1499_s3, %s1495_s14 }
  0x2c   :  { %p1502_p4 = por %p1501_p3, %p1500_p2 }
  0x2e   :  { %p1503_p5 = pnand %p1502_p4, %p1496_p1 }
  0x30   :  { %1506 = shalt.err (!%p1503_p5)
}
  0x31   :  { %108 = dma.hbm_to_vmem [thread:$0]  %s2043_s7, 16, %s106_s11, [#allocation16]  }
  0x32   :  { %s1515_s19 = scalar_lea.vmem %s28_s13, 128  ;;  %p1520_p7 = scmp.lt.s32.totalorder %s28_s13, %s28_s13 }
  0x33   :  { %p1516_p6 = scmp.ne.s32.totalorder %s28_s13, %s1515_s19  ;;  %p1521_p8 = scmp.lt.s32.totalorder %s1515_s19, %s1515_s19 }
  0x35   :  { %p1522_p9 = por %p1521_p8, %p1520_p7 }
  0x37   :  { %p1523_p10 = pnand %p1522_p9, %p1516_p6 }
  0x39   :  { %1526 = shalt.err (!%p1523_p10)
}
  0x3a   :  { %30 = dma.hbm_to_vmem [thread:$0]  %s2036_s0, 128, %s28_s13, [#allocation4]  }
  0x3b   :  { %s1646_s21 = smov [#allocation8]   ;;  %s1647_s23 = smov [#allocation11]  }
  0x3c   :  { %s49_s22 = sshll.u32 %s1646_s21, 4  ;;  %s70_s24 = sshll.u32 %s1647_s23, 4  ;;  %s50_s22 = int_to_ptr.vmem [resolvable:$true] %s49_s22  ;;  %s71_s24 = int_to_ptr.vmem [resolvable:$true] %s70_s24 }
  0x3d   :  { %s1535_s25 = scalar_lea.vmem %s50_s22, 16  ;;  %s1539_s7 = scalar_lea.vmem %s50_s22, 32 }
  0x3e   :  { %p1536_p11 = scmp.ne.s32.totalorder %s50_s22, %s1535_s25  ;;  %p1540_p12 = scmp.lt.s32.totalorder %s50_s22, %s50_s22 }
  0x3f   :  { %p1541_p13 = scmp.lt.s32.totalorder %s1539_s7, %s1535_s25 }
  0x41   :  { %p1542_p0 = por %p1541_p13, %p1540_p12 }
  0x43   :  { %p1543_p1 = pnand %p1542_p0, %p1536_p11 }
  0x45   :  { %1546 = shalt.err (!%p1543_p1)
}
  0x46   :  { %52 = dma.hbm_to_vmem [thread:$0]  %s2038_s2, 16, %s50_s22, [#allocation7]  }
  0x47   :  { %s1555_s27 = scalar_lea.vmem %s71_s24, 2048  ;;  %p1560_p3 = scmp.lt.s32.totalorder %s71_s24, %s71_s24 }
  0x48   :  { %p1556_p2 = scmp.ne.s32.totalorder %s71_s24, %s1555_s27  ;;  %p1561_p4 = scmp.lt.s32.totalorder %s1555_s27, %s1555_s27 }
  0x4a   :  { %p1562_p5 = por %p1561_p4, %p1560_p3 }
  0x4c   :  { %p1563_p6 = pnand %p1562_p5, %p1556_p2 }
  0x4e   :  { %1566 = shalt.err (!%p1563_p6)
}
  0x4f   :  { %76 = dma.hbm_to_vmem [thread:$0]  %s2040_s4, 2048, %s71_s24, [#allocation10], %s1640_s16, %s1640_s16, %s1641_s17  }
  0x50   :  { %s1648_s29 = smov [#allocation14]   ;;  %s1649_s11 = smov [#allocation17]  }
  0x51   :  { %s92_s30 = sshll.u32 %s1648_s29, 4  ;;  %s114_s2 = sshll.u32 %s1649_s11, 4  ;;  %s93_s30 = int_to_ptr.vmem [resolvable:$true] %s92_s30  ;;  %s115_s2 = int_to_ptr.vmem [resolvable:$true] %s114_s2 }
  0x52   :  { %s1575_s12 = scalar_lea.vmem %s93_s30, 2048  ;;  %p1580_p8 = scmp.lt.s32.totalorder %s93_s30, %s93_s30 }
  0x53   :  { %p1576_p7 = scmp.ne.s32.totalorder %s93_s30, %s1575_s12  ;;  %p1581_p9 = scmp.lt.s32.totalorder %s1575_s12, %s1575_s12 }
  0x55   :  { %p1582_p10 = por %p1581_p9, %p1580_p8 }
  0x57   :  { %p1583_p11 = pnand %p1582_p10, %p1576_p7 }
  0x59   :  { %1586 = shalt.err (!%p1583_p11)
}
  0x5a   :  { %98 = dma.hbm_to_vmem [thread:$0]  %s2042_s6, 2048, %s93_s30, [#allocation13], %s1640_s16, %s1640_s16, %s1641_s17  }
  0x5b   :  { %s1595_s4 = scalar_lea.vmem %s115_s2, 256  ;;  %p1600_p13 = scmp.lt.s32.totalorder %s115_s2, %s115_s2 }
  0x5c   :  { %p1596_p12 = scmp.ne.s32.totalorder %s115_s2, %s1595_s4  ;;  %p1601_p0 = scmp.lt.s32.totalorder %s1595_s4, %s1595_s4 }
  0x5e   :  { %p1602_p1 = por %p1601_p0, %p1600_p13 }
  0x60   :  { %p1603_p2 = pnand %p1602_p1, %p1596_p12 }
  0x62   :  { %1606 = shalt.err (!%p1603_p2)
}
  0x63   :  { %120 = dma.hbm_to_vmem [thread:$0]  %s2044_s8, 256, %s115_s2, [#allocation16], %s1640_s16, %s1640_s16, %s1641_s17  }
  0x64   :  { %1627 = dma.done.wait [#allocation4], 128  }
  0x65   :  { %1628 = vsyncadd [#allocation4], 4294967168 }
  0x66   :  { %1629 = dma.done.wait [#allocation7], 2064  }
  0x67   :  { %1630 = vsyncadd [#allocation7], 4294965232 }
  0x68   :  { %1631 = dma.done.wait [#allocation10], 4096  }
  0x69   :  { %1632 = vsyncadd [#allocation10], 4294963200 }
  0x6a   :  { %1633 = dma.done.wait [#allocation13], 2064  }
  0x6b   :  { %1634 = vsyncadd [#allocation13], 4294965232 }
  0x6c   :  { %1635 = dma.done.wait [#allocation16], 272  }
  0x6d   :  { %1636 = vsyncadd [#allocation16], 4294967024  ;;  %v1650_v0 = vmov 0.0   ;;  %vm1651_vm0 = vmmov 0   ;;  %v169_v1 = vld [vmem:[#allocation6 + $0x78] sm:$0xff]  ;;  %v168_v2 = vld [vmem:[#allocation6 + $0x70] sm:$0xff] }
  0x6e   :  { %1173 = vmatprep.subr.mxu0 %v1650_v0  ;;  %1205 = vmatprep.mubr.msk.f32.mxu0 %vm1651_vm0, %v1650_v0  ;;  %v167_v3 = vld [vmem:[#allocation6 + $0x68] sm:$0xff]  ;;  %v166_v4 = vld [vmem:[#allocation6 + $0x60] sm:$0xff]  ;;  %v165_v5 = vld [vmem:[#allocation6 + $0x58] sm:$0xff]  ;;  %vm253_vm1 = vcmask 195584  }
  0x6f   :  { %1218 = vmatprep.subr.mxu1 %v1650_v0  ;;  %1250 = vmatprep.mubr.msk.f32.mxu1 %vm1651_vm0, %v1650_v0  ;;  %v164_v6 = vld [vmem:[#allocation6 + $0x50] sm:$0xff]  ;;  %v163_v7 = vld [vmem:[#allocation6 + $0x48] sm:$0xff]  ;;  %v162_v8 = vld [vmem:[#allocation6 + $0x40] sm:$0xff] }
  0x70   :  { %1174 = vmatpush3.msra.mxu0 %v169_v1  ;;  %v161_v9 = vld [vmem:[#allocation6 + $0x38] sm:$0xff]  ;;  %v160_v10 = vld [vmem:[#allocation6 + $0x30] sm:$0xff]  ;;  %v159_v11 = vld [vmem:[#allocation6 + $0x28] sm:$0xff] }
  0x71   :  { %1175 = vmatprep.subr.mxu0 %v1650_v0  ;;  %v158_v12 = vld [vmem:[#allocation6 + $0x20] sm:$0xff]  ;;  %v157_v13 = vld [vmem:[#allocation6 + $0x18] sm:$0xff]  ;;  %v156_v14 = vld [vmem:[#allocation6 + $0x10] sm:$0xff] }
  0x72   :  { %1176 = vmatpush3.msra.mxu0 %v168_v2  ;;  %v155_v15 = vld [vmem:[#allocation6 + $0x8] sm:$0xff]  ;;  %v154_v16 = vld [vmem:[#allocation6] sm:$0xff]  ;;  %v153_v17 = vld [vmem:[#allocation3] sm:$0xff] }
  0x73   :  { %1177 = vmatprep.subr.mxu0 %v1650_v0  ;;  %v1774_v18 = vld [vmem:[#allocation11 + $0x78] sm:$0xff]  ;;  %v1778_v19 = vld [vmem:[#allocation11 + $0x70] sm:$0xff]  ;;  %v1782_v20 = vld [vmem:[#allocation11 + $0x68] sm:$0xff] }
  0x74   :  { %1178 = vmatpush3.msra.mxu0 %v167_v3  ;;  %1219 = vmatpush3.msra.mxu1 %v1774_v18  ;;  %v1786_v21 = vld [vmem:[#allocation11 + $0x60] sm:$0xff]  ;;  %v1790_v22 = vld [vmem:[#allocation11 + $0x58] sm:$0xff]  ;;  %v1794_v23 = vld [vmem:[#allocation11 + $0x50] sm:$0xff] }
  0x75   :  { %1179 = vmatprep.subr.mxu0 %v1650_v0  ;;  %1220 = vmatprep.subr.mxu1 %v1650_v0  ;;  %v1798_v24 = vld [vmem:[#allocation11 + $0x48] sm:$0xff]  ;;  %v1802_v25 = vld [vmem:[#allocation11 + $0x40] sm:$0xff]  ;;  %v1806_v26 = vld [vmem:[#allocation11 + $0x38] sm:$0xff] }
  0x76   :  { %1180 = vmatpush3.msra.mxu0 %v166_v4  ;;  %1221 = vmatpush3.msra.mxu1 %v1778_v19  ;;  %v1810_v27 = vld [vmem:[#allocation11 + $0x30] sm:$0xff]  ;;  %v1814_v28 = vld [vmem:[#allocation11 + $0x28] sm:$0xff]  ;;  %v1818_v29 = vld [vmem:[#allocation11 + $0x20] sm:$0xff] }
  0x77   :  { %1181 = vmatprep.subr.mxu0 %v1650_v0  ;;  %1222 = vmatprep.subr.mxu1 %v1650_v0  ;;  %v1822_v30 = vld [vmem:[#allocation11 + $0x18] sm:$0xff]  ;;  %v252_v36 = vld [vmem:[#allocation17] sm:$0xff]  ;;  %v1841_v39 = vld [vmem:[#allocation9 + $0x70] sm:$0xff] }
  0x78   :  { %1182 = vmatpush3.msra.mxu0 %v165_v5  ;;  %1223 = vmatpush3.msra.mxu1 %v1782_v20  ;;  %v1050_v31 = vld [vmem:[#allocation8] ss:$0 sm:$0xff]  ;;  %v327_v37 = vld [vmem:[%s2045_s9] sm:$0xff]  ;;  %v1847_v40 = vld [vmem:[#allocation9 + $0x68] sm:$0xff] }
  0x79   :  { %1183 = vmatprep.subr.mxu0 %v1650_v0  ;;  %1224 = vmatprep.subr.mxu1 %v1650_v0  ;;  %v1838_v38 = vld [vmem:[#allocation9 + $0x78] sm:$0xff]  ;;  %v1851_v41 = vld [vmem:[#allocation9 + $0x60] sm:$0xff]  ;;  %v1859_v43 = vld [vmem:[#allocation9 + $0x50] sm:$0xff] }
  0x7a   :  { %1184 = vmatpush3.msra.mxu0 %v164_v6  ;;  %1225 = vmatpush3.msra.mxu1 %v1786_v21  ;;  %v1855_v42 = vld [vmem:[#allocation9 + $0x58] sm:$0xff]  ;;  %v1863_v44 = vld [vmem:[#allocation9 + $0x48] sm:$0xff]  ;;  %v1867_v45 = vld [vmem:[#allocation9 + $0x40] sm:$0xff] }
  0x7b   :  { %1185 = vmatprep.subr.mxu0 %v1650_v0  ;;  %1226 = vmatprep.subr.mxu1 %v1650_v0  ;;  %v1871_v46 = vld [vmem:[#allocation9 + $0x38] sm:$0xff]  ;;  %v1875_v47 = vld [vmem:[#allocation9 + $0x30] sm:$0xff]  ;;  %v1879_v48 = vld [vmem:[#allocation9 + $0x28] sm:$0xff] }
  0x7c   :  { %1186 = vmatpush3.msra.mxu0 %v163_v7  ;;  %1227 = vmatpush3.msra.mxu1 %v1790_v22  ;;  %v1883_v49 = vld [vmem:[#allocation9 + $0x20] sm:$0xff]  ;;  %v1887_v50 = vld [vmem:[#allocation9 + $0x18] sm:$0xff]  ;;  %v1891_v51 = vld [vmem:[#allocation9 + $0x10] sm:$0xff] }
  0x7d   :  { %1187 = vmatprep.subr.mxu0 %v1650_v0  ;;  %1228 = vmatprep.subr.mxu1 %v1650_v0  ;;  %v1895_v52 = vld [vmem:[#allocation9 + $0x8] sm:$0xff]  ;;  %v1901_v53 = vld [vmem:[#allocation11 + $0x10] sm:$0xff]  ;;  %v1903_v54 = vld [vmem:[#allocation9] sm:$0xff] }
  0x7e   :  { %1188 = vmatpush3.msra.mxu0 %v162_v8  ;;  %1229 = vmatpush3.msra.mxu1 %v1794_v23  ;;  %v1908_v55 = vld [vmem:[#allocation11 + $0x8] sm:$0xff]  ;;  %v1913_v56 = vld [vmem:[#allocation11] sm:$0xff] }
  0x7f   :  { %1189 = vmatprep.subr.mxu0 %v1650_v0  ;;  %1230 = vmatprep.subr.mxu1 %v1650_v0  ;;  %v1921_v1 = vld [vmem:[#allocation12] ss:$0 sm:$0xff]  ;;  %v588_v7 = vld [vmem:[#allocation17 + $0x8] sm:$0xff] }
  0x80   :  { %1190 = vmatpush3.msra.mxu0 %v161_v9  ;;  %1231 = vmatpush3.msra.mxu1 %v1798_v24  ;;  %v1055_v6 = vld [vmem:[%s2045_s9 + $0x8] sm:$0xff]  ;;  %s1652_s9 = smov [#allocation18]  }
  0x81   :  { %1191 = vmatprep.subr.mxu0 %v1650_v0  ;;  %1232 = vmatprep.subr.mxu1 %v1650_v0  ;;  %v938_v8 = vld [vmem:[#allocation14 + $0x78] sm:$0xff]  ;;  %s1034_s5 = sshll.u32 %s1652_s9, 4  ;;  %s1035_s5 = int_to_ptr.vmem [resolvable:$true] %s1034_s5 }
  0x82   :  { %1192 = vmatpush3.msra.mxu0 %v160_v10  ;;  %1233 = vmatpush3.msra.mxu1 %v1802_v25  ;;  %s1607_s20 = scalar_lea.vmem %s1035_s5, 384  ;;  %p1612_p4 = scmp.lt.s32.totalorder %s1035_s5, %s1035_s5 }
  0x83   :  { %1193 = vmatprep.subr.mxu0 %v1650_v0  ;;  %1234 = vmatprep.subr.mxu1 %v1650_v0  ;;  %p1608_p3 = scmp.ne.s32.totalorder %s1035_s5, %s1607_s20  ;;  %p1613_p5 = scmp.lt.s32.totalorder %s1607_s20, %s1607_s20 }
  0x84   :  { %1194 = vmatpush3.msra.mxu0 %v159_v11  ;;  %1235 = vmatpush3.msra.mxu1 %v1806_v26  ;;  %v937_v11 = vld [vmem:[#allocation14 + $0x70] sm:$0xff] }
  0x85   :  { %1195 = vmatprep.subr.mxu0 %v1650_v0  ;;  %1236 = vmatprep.subr.mxu1 %v1650_v0  ;;  %p1614_p6 = por %p1613_p5, %p1612_p4 }
  0x86   :  { %1196 = vmatpush3.msra.mxu0 %v158_v12  ;;  %1237 = vmatpush3.msra.mxu1 %v1810_v27 }
  0x87   :  { %1197 = vmatprep.subr.mxu0 %v1650_v0  ;;  %1238 = vmatprep.subr.mxu1 %v1650_v0  ;;  %p1615_p7 = pnand %p1614_p6, %p1608_p3 }
  0x88   :  { %1198 = vmatpush3.msra.mxu0 %v157_v13  ;;  %1239 = vmatpush3.msra.mxu1 %v1814_v28 }
  0x89   :  { %1199 = vmatprep.subr.mxu0 %v1650_v0  ;;  %1240 = vmatprep.subr.mxu1 %v1650_v0 }
  0x8a   :  { %1200 = vmatpush3.msra.mxu0 %v156_v14  ;;  %1241 = vmatpush3.msra.mxu1 %v1818_v29  ;;  %v936_v14 = vld [vmem:[#allocation14 + $0x68] sm:$0xff] }
  0x8b   :  { %1201 = vmatprep.subr.mxu0 %v1650_v0  ;;  %1242 = vmatprep.subr.mxu1 %v1650_v0 }
  0x8c   :  { %1202 = vmatpush3.msra.mxu0 %v155_v15  ;;  %1243 = vmatpush3.msra.mxu1 %v1822_v30  ;;  %v935_v15 = vld [vmem:[#allocation14 + $0x60] sm:$0xff] }
  0x8d   :  { %1203 = vmatprep.subr.mxu0 %v1650_v0  ;;  %1244 = vmatprep.subr.mxu1 %v1650_v0 }
  0x8e   :  { %1204 = vmatpush3.msra.mxu0 %v154_v16  ;;  %1245 = vmatpush3.msra.mxu1 %v1901_v53  ;;  %v934_v16 = vld [vmem:[#allocation14 + $0x58] sm:$0xff] }
  0x8f   :  { %1206 = vmatmul.mubr.f32.vlgmr.msra.gmra.mxu0 %v153_v17  ;;  %1208 = vmatprep.subr.mxu0 %v1650_v0  ;;  %v933_v17 = vld [vmem:[#allocation14 + $0x50] sm:$0xff] }
  0x90   :  { %1210 = vmatprep.mubr.msk.f32.mxu0 %vm1651_vm0, %v1650_v0  ;;  %1246 = vmatprep.subr.mxu1 %v1650_v0 }
  0x91   :  { %1247 = vmatpush3.msra.mxu1 %v1908_v55 }
  0x92   :  { %1248 = vmatprep.subr.mxu1 %v1650_v0 }
  0x93   :  { %1249 = vmatpush3.msra.mxu1 %v1913_v56 }
  0x94   :  { %1295 = vmatprep.subr.mxu1 %v1650_v0 }
 0x14f   :  { %v243_v32 = vpop.f32.mrf.mxu0 }
 0x150   :  { %v244_v33 = vadd.f32 %v1050_v31, %v243_v32 }
 0x151   :  { %v1207_v34 = vpop.f32.mrf.mxu0 }
 0x152   :  { %v1826_v35 = vmax.f32 %v244_v33, 0.0 }
 0x154   :  { %1209 = vmatpush3.msra.mxu0 %v1826_v35 }
 0x155   :  { %1211 = vmatmul.mubr.msk.f32.vlgmr.msra.gmra.mxu0 %vm253_vm1, %v252_v36  ;;  %1213 = vmatprep.subr.mxu0 %v1650_v0  ;;  %v1058_v36 = vld [vmem:[#allocation15] ss:$0 sm:$0xff] }
 0x156   :  { %1214 = vmatpush3.msra.mxu0 %v1826_v35  ;;  %1215 = vmatprep.mubr.msk.f32.mxu0 %vm1651_vm0, %v1650_v0 }
 0x157   :  { %1253 = vmatprep.subr.mxu0 %v1650_v0 }
 0x159   :  { %1216 = vmatmul.mubr.msk.f32.vlgmr.msra.gmra.mxu0 %vm253_vm1, %v327_v37 }
 0x15a   :  { %1254 = vmatpush3.msra.mxu0 %v1838_v38  ;;  %1285 = vmatprep.mubr.msk.f32.mxu0 %vm1651_vm0, %v1650_v0 }
 0x15b   :  { %1255 = vmatprep.subr.mxu0 %v1650_v0 }
 0x15c   :  { %1256 = vmatpush3.msra.mxu0 %v1841_v39 }
 0x15d   :  { %1257 = vmatprep.subr.mxu0 %v1650_v0 }
 0x15e   :  { %1258 = vmatpush3.msra.mxu0 %v1847_v40 }
 0x15f   :  { %1259 = vmatprep.subr.mxu0 %v1650_v0 }
 0x160   :  { %1260 = vmatpush3.msra.mxu0 %v1851_v41 }
 0x161   :  { %1261 = vmatprep.subr.mxu0 %v1650_v0 }
 0x162   :  { %1262 = vmatpush3.msra.mxu0 %v1855_v42 }
 0x163   :  { %1263 = vmatprep.subr.mxu0 %v1650_v0 }
 0x164   :  { %1264 = vmatpush3.msra.mxu0 %v1859_v43 }
 0x165   :  { %1265 = vmatprep.subr.mxu0 %v1650_v0 }
 0x166   :  { %1266 = vmatpush3.msra.mxu0 %v1863_v44 }
 0x167   :  { %1267 = vmatprep.subr.mxu0 %v1650_v0 }
 0x168   :  { %1268 = vmatpush3.msra.mxu0 %v1867_v45 }
 0x169   :  { %1269 = vmatprep.subr.mxu0 %v1650_v0 }
 0x16a   :  { %1270 = vmatpush3.msra.mxu0 %v1871_v46 }
 0x16b   :  { %1271 = vmatprep.subr.mxu0 %v1650_v0 }
 0x16c   :  { %1272 = vmatpush3.msra.mxu0 %v1875_v47 }
 0x16d   :  { %1273 = vmatprep.subr.mxu0 %v1650_v0 }
 0x16e   :  { %1274 = vmatpush3.msra.mxu0 %v1879_v48 }
 0x16f   :  { %1275 = vmatprep.subr.mxu0 %v1650_v0 }
 0x170   :  { %1276 = vmatpush3.msra.mxu0 %v1883_v49 }
 0x171   :  { %1277 = vmatprep.subr.mxu0 %v1650_v0 }
 0x172   :  { %1278 = vmatpush3.msra.mxu0 %v1887_v50 }
 0x173   :  { %1279 = vmatprep.subr.mxu0 %v1650_v0 }
 0x174   :  { %1280 = vmatpush3.msra.mxu0 %v1891_v51 }
 0x175   :  { %1281 = vmatprep.subr.mxu0 %v1650_v0 }
 0x176   :  { %1282 = vmatpush3.msra.mxu0 %v1895_v52 }
 0x177   :  { %1283 = vmatprep.subr.mxu0 %v1650_v0 }
 0x178   :  { %1284 = vmatpush3.msra.mxu0 %v1903_v54 }
 0x179   :  { %1288 = vmatprep.subr.mxu0 %v1650_v0 }
 0x215   :  { %v323_v57 = vpop.f32.mrf.mxu0 }
 0x216   :  { %1286 = vmatmul.mubr.f32.vlgmr.msra.gmra.mxu0 %v323_v57 }
 0x217   :  { %v1212_v58 = vpop.f32.mrf.mxu0  ;;  %1292 = vmatprep.mubr.msk.f32.mxu0 %vm1651_vm0, %v1650_v0 }
 0x219   :  { %v397_v59 = vpop.f32.mrf.mxu0 }
 0x21a   :  { %1251 = vmatmul.mubr.f32.vlgmr.msra.gmra.mxu1 %v397_v59 }
 0x21b   :  { %v1217_v60 = vpop.f32.mrf.mxu0  ;;  %1299 = vmatprep.mubr.msk.f32.mxu1 %vm1651_vm0, %v1650_v0 }
 0x2d6   :  { %v569_v61 = vpop.f32.mrf.mxu0 }
 0x2d8   :  { %v1287_v62 = vpop.f32.mrf.mxu0 }
 0x2da   :  { %v499_v63 = vpop.f32.mrf.mxu1 }
 0x2db   :  { %v570_v2 = vadd.f32 %v569_v61, %v499_v63 }
 0x2dc   :  { %v1252_v3 = vpop.f32.mrf.mxu1 }
 0x2dd   :  { %v580_v4 = vadd.f32 %v1921_v1, %v570_v2 }
 0x2df   :  { %v1924_v5 = vmax.f32 %v580_v4, 0.0 }
 0x2e1   :  { %1289 = vmatpush3.msra.mxu0 %v1924_v5  ;;  %1296 = vmatpush3.msra.mxu1 %v1924_v5 }
 0x2e2   :  { %1290 = vmatprep.subr.mxu0 %v1650_v0  ;;  %1297 = vmatprep.subr.mxu1 %v1650_v0 }
 0x2e3   :  { %1291 = vmatpush3.msra.mxu0 %v1826_v35  ;;  %1298 = vmatpush3.msra.mxu1 %v1826_v35 }
 0x2e4   :  { %1300 = vmatmul.mubr.msk.f32.vlgmr.msra.gmra.mxu1 %vm253_vm1, %v1055_v6  ;;  %1293 = vmatmul.mubr.msk.f32.vlgmr.msra.gmra.mxu0 %vm253_vm1, %v588_v7 }
 0x2e5   :  { %1302 = vmatprep.subr.mxu1 %v1650_v0  ;;  %1337 = vmatprep.subr.mxu0 %v1650_v0 }
 0x2e6   :  { %1303 = vmatpush3.msra.mxu1 %v1774_v18  ;;  %1338 = vmatpush3.msra.mxu0 %v1838_v38  ;;  %v932_v18 = vld [vmem:[#allocation14 + $0x48] sm:$0xff] }
 0x2e7   :  { %1304 = vmatprep.subr.mxu1 %v1650_v0  ;;  %1339 = vmatprep.subr.mxu0 %v1650_v0 }
 0x2e8   :  { %1305 = vmatpush3.msra.mxu1 %v1778_v19  ;;  %1340 = vmatpush3.msra.mxu0 %v1841_v39  ;;  %v931_v19 = vld [vmem:[#allocation14 + $0x40] sm:$0xff] }
 0x2e9   :  { %1306 = vmatprep.subr.mxu1 %v1650_v0  ;;  %1341 = vmatprep.subr.mxu0 %v1650_v0 }
 0x2ea   :  { %1307 = vmatpush3.msra.mxu1 %v1782_v20  ;;  %1342 = vmatpush3.msra.mxu0 %v1847_v40  ;;  %v930_v20 = vld [vmem:[#allocation14 + $0x38] sm:$0xff] }
 0x2eb   :  { %1308 = vmatprep.subr.mxu1 %v1650_v0  ;;  %1343 = vmatprep.subr.mxu0 %v1650_v0 }
 0x2ec   :  { %1309 = vmatpush3.msra.mxu1 %v1786_v21  ;;  %1344 = vmatpush3.msra.mxu0 %v1851_v41  ;;  %v929_v21 = vld [vmem:[#allocation14 + $0x30] sm:$0xff] }
 0x2ed   :  { %1310 = vmatprep.subr.mxu1 %v1650_v0  ;;  %1345 = vmatprep.subr.mxu0 %v1650_v0 }
 0x2ee   :  { %1311 = vmatpush3.msra.mxu1 %v1790_v22  ;;  %1346 = vmatpush3.msra.mxu0 %v1855_v42  ;;  %v928_v22 = vld [vmem:[#allocation14 + $0x28] sm:$0xff] }
 0x2ef   :  { %1312 = vmatprep.subr.mxu1 %v1650_v0  ;;  %1347 = vmatprep.subr.mxu0 %v1650_v0 }
 0x2f0   :  { %1313 = vmatpush3.msra.mxu1 %v1794_v23  ;;  %1348 = vmatpush3.msra.mxu0 %v1859_v43  ;;  %v927_v23 = vld [vmem:[#allocation14 + $0x20] sm:$0xff] }
 0x2f1   :  { %1314 = vmatprep.subr.mxu1 %v1650_v0  ;;  %1349 = vmatprep.subr.mxu0 %v1650_v0 }
 0x2f2   :  { %1315 = vmatpush3.msra.mxu1 %v1798_v24  ;;  %1350 = vmatpush3.msra.mxu0 %v1863_v44  ;;  %v926_v24 = vld [vmem:[#allocation14 + $0x18] sm:$0xff] }
 0x2f3   :  { %1316 = vmatprep.subr.mxu1 %v1650_v0  ;;  %1351 = vmatprep.subr.mxu0 %v1650_v0 }
 0x2f4   :  { %1317 = vmatpush3.msra.mxu1 %v1802_v25  ;;  %1352 = vmatpush3.msra.mxu0 %v1867_v45  ;;  %v925_v25 = vld [vmem:[#allocation14 + $0x10] sm:$0xff] }
 0x2f5   :  { %1318 = vmatprep.subr.mxu1 %v1650_v0  ;;  %1353 = vmatprep.subr.mxu0 %v1650_v0 }
 0x2f6   :  { %1319 = vmatpush3.msra.mxu1 %v1806_v26  ;;  %1354 = vmatpush3.msra.mxu0 %v1871_v46  ;;  %v924_v26 = vld [vmem:[#allocation14 + $0x8] sm:$0xff] }
 0x2f7   :  { %1320 = vmatprep.subr.mxu1 %v1650_v0  ;;  %1355 = vmatprep.subr.mxu0 %v1650_v0 }
 0x2f8   :  { %1321 = vmatpush3.msra.mxu1 %v1810_v27  ;;  %1356 = vmatpush3.msra.mxu0 %v1875_v47  ;;  %v923_v27 = vld [vmem:[#allocation14] sm:$0xff] }
 0x2f9   :  { %1322 = vmatprep.subr.mxu1 %v1650_v0  ;;  %1357 = vmatprep.subr.mxu0 %v1650_v0 }
 0x2fa   :  { %1323 = vmatpush3.msra.mxu1 %v1814_v28  ;;  %1358 = vmatpush3.msra.mxu0 %v1879_v48 }
 0x2fb   :  { %1324 = vmatprep.subr.mxu1 %v1650_v0  ;;  %1359 = vmatprep.subr.mxu0 %v1650_v0 }
 0x2fc   :  { %1325 = vmatpush3.msra.mxu1 %v1818_v29  ;;  %1360 = vmatpush3.msra.mxu0 %v1883_v49 }
 0x2fd   :  { %1326 = vmatprep.subr.mxu1 %v1650_v0  ;;  %1361 = vmatprep.subr.mxu0 %v1650_v0 }
 0x2fe   :  { %1327 = vmatpush3.msra.mxu1 %v1822_v30  ;;  %1362 = vmatpush3.msra.mxu0 %v1887_v50 }
 0x2ff   :  { %1328 = vmatprep.subr.mxu1 %v1650_v0  ;;  %1363 = vmatprep.subr.mxu0 %v1650_v0 }
 0x300   :  { %1329 = vmatpush3.msra.mxu1 %v1901_v53  ;;  %1364 = vmatpush3.msra.mxu0 %v1891_v51 }
 0x301   :  { %1330 = vmatprep.subr.mxu1 %v1650_v0  ;;  %1365 = vmatprep.subr.mxu0 %v1650_v0 }
 0x302   :  { %1331 = vmatpush3.msra.mxu1 %v1908_v55  ;;  %1366 = vmatpush3.msra.mxu0 %v1895_v52 }
 0x303   :  { %1332 = vmatprep.subr.mxu1 %v1650_v0  ;;  %1334 = vmatprep.mubr.msk.f32.mxu1 %vm1651_vm0, %v1650_v0 }
 0x304   :  { %1333 = vmatpush3.msra.mxu1 %v1913_v56  ;;  %1367 = vmatprep.subr.mxu0 %v1650_v0 }
 0x305   :  { %1372 = vmatprep.subr.mxu1 %v1650_v0  ;;  %1368 = vmatpush3.msra.mxu0 %v1903_v54 }
 0x306   :  { %1369 = vmatprep.mubr.msk.f32.mxu0 %vm1651_vm0, %v1650_v0 }
 0x3a4   :  { %v733_v9 = vpop.f32.mrf.mxu1  ;;  %v658_v10 = vpop.f32.mrf.mxu0 }
 0x3a5   :  { %1335 = vmatmul.mubr.f32.vlgmr.msra.gmra.mxu1 %v733_v9  ;;  %1370 = vmatmul.mubr.f32.vlgmr.msra.gmra.mxu0 %v658_v10 }
 0x3a6   :  { %1373 = vmatpush3.msra.mxu1 %v938_v8  ;;  %v1294_v12 = vpop.f32.mrf.mxu0  ;;  %v1301_v13 = vpop.f32.mrf.mxu1  ;;  %1404 = vmatprep.mubr.msk.f32.mxu1 %vm1651_vm0, %v1650_v0 }
 0x3a7   :  { %1374 = vmatprep.subr.mxu1 %v1650_v0 }
 0x3a8   :  { %1375 = vmatpush3.msra.mxu1 %v937_v11 }
 0x3a9   :  { %1376 = vmatprep.subr.mxu1 %v1650_v0 }
 0x3aa   :  { %1377 = vmatpush3.msra.mxu1 %v936_v14 }
 0x3ab   :  { %1378 = vmatprep.subr.mxu1 %v1650_v0 }
 0x3ac   :  { %1379 = vmatpush3.msra.mxu1 %v935_v15 }
 0x3ad   :  { %1380 = vmatprep.subr.mxu1 %v1650_v0 }
 0x3ae   :  { %1381 = vmatpush3.msra.mxu1 %v934_v16 }
 0x3af   :  { %1382 = vmatprep.subr.mxu1 %v1650_v0 }
 0x3b0   :  { %1383 = vmatpush3.msra.mxu1 %v933_v17 }
 0x3b1   :  { %1384 = vmatprep.subr.mxu1 %v1650_v0 }
 0x3b2   :  { %1385 = vmatpush3.msra.mxu1 %v932_v18 }
 0x3b3   :  { %1386 = vmatprep.subr.mxu1 %v1650_v0 }
 0x3b4   :  { %1387 = vmatpush3.msra.mxu1 %v931_v19 }
 0x3b5   :  { %1388 = vmatprep.subr.mxu1 %v1650_v0 }
 0x3b6   :  { %1389 = vmatpush3.msra.mxu1 %v930_v20 }
 0x3b7   :  { %1390 = vmatprep.subr.mxu1 %v1650_v0 }
 0x3b8   :  { %1391 = vmatpush3.msra.mxu1 %v929_v21 }
 0x3b9   :  { %1392 = vmatprep.subr.mxu1 %v1650_v0 }
 0x3ba   :  { %1393 = vmatpush3.msra.mxu1 %v928_v22 }
 0x3bb   :  { %1394 = vmatprep.subr.mxu1 %v1650_v0 }
 0x3bc   :  { %1395 = vmatpush3.msra.mxu1 %v927_v23 }
 0x3bd   :  { %1396 = vmatprep.subr.mxu1 %v1650_v0 }
 0x3be   :  { %1397 = vmatpush3.msra.mxu1 %v926_v24 }
 0x3bf   :  { %1398 = vmatprep.subr.mxu1 %v1650_v0 }
 0x3c0   :  { %1399 = vmatpush3.msra.mxu1 %v925_v25 }
 0x3c1   :  { %1400 = vmatprep.subr.mxu1 %v1650_v0 }
 0x3c2   :  { %1401 = vmatpush3.msra.mxu1 %v924_v26 }
 0x3c3   :  { %1402 = vmatprep.subr.mxu1 %v1650_v0 }
 0x3c4   :  { %1403 = vmatpush3.msra.mxu1 %v923_v27 }
 0x3c5   :  { %1405 = vmatmul.mubr.f32.vlgmr.msra.gmra.mxu1 %v1826_v35 }
 0x3c6   :  { %1407 = vmatprep.mubr.msk.f32.mxu1 %vm1651_vm0, %v1650_v0 }
 0x3c9   :  { %1408 = vmatmul.mubr.f32.gmra.mxu1 %v1924_v5 }
 0x3ca   :  { %1410 = vmatprep.mubr.msk.f32.mxu1 %vm1651_vm0, %v1650_v0 }
 0x465   :  { %v835_v28 = vpop.f32.mrf.mxu1  ;;  %v905_v29 = vpop.f32.mrf.mxu0 }
 0x466   :  { %v906_v30 = vadd.f32 %v905_v29, %v835_v28 }
 0x467   :  { %v1336_v31 = vpop.f32.mrf.mxu1  ;;  %v1371_v32 = vpop.f32.mrf.mxu0 }
 0x468   :  { %v916_v33 = vadd.f32 %v1921_v1, %v906_v30 }
 0x46a   :  { %v917_v34 = vmax.f32 %v916_v33, 0.0 }
 0x46c   :  { %1411 = vmatmul.mubr.f32.gmra.mxu1 %v917_v34 }
 0x485   :  { %v1012_v37 = vpop.f32.mrf.mxu1 }
 0x486   :  { %v1013_v35 = vadd.f32 %v1058_v36, %v1012_v37 }
 0x487   :  { %v1406_v38 = vpop.f32.mrf.mxu1 }
 0x488   :  { %1026 = vst [vmem:[#allocation18] sm:$0xff] %v1013_v35 }
 0x489   :  { %v1017_v39 = vpop.f32.mrf.mxu1 }
 0x48a   :  { %v1018_v40 = vadd.f32 %v1058_v36, %v1017_v39 }
 0x48b   :  { %v1409_v41 = vpop.f32.mrf.mxu1 }
 0x48c   :  { %1027 = vst [vmem:[#allocation18 + $0x8] sm:$0xff] %v1018_v40 }
 0x52c   :  { %v1022_v0 = vpop.f32.mrf.mxu1 }
 0x52d   :  { %v1023_v42 = vadd.f32 %v1058_v36, %v1022_v0 }
 0x52e   :  { %v1412_v43 = vpop.f32.mrf.mxu1 }
 0x52f   :  { %1028 = vst [vmem:[#allocation18 + $0x10] sm:$0xff] %v1023_v42 }
 0x530   :  { %1618 = shalt.err (!%p1615_p7)
}
 0x531   :  { %1040 = dma.vmem_to_hbm [thread:$0]  %s1035_s5, 384, %s2046_s10, [#allocation5], %s1640_s16, %s1640_s16, %s1641_s17  }
 0x532   :  { %1637 = dma.done.wait [#allocation5], 384  }
 0x533   :  { %1638 = vsyncadd [#allocation5], 4294966912 }
 0x534   :  { %1044 = vsyncpa [#allocation4], 1 }
 0x535   :  { %1045 = vsyncpa [#allocation7], 1 }
 0x536   :  { %1046 = vsyncpa [#allocation10], 1 }
 0x537   :  { %1047 = vsyncpa [#allocation13], 1 }
 0x538   :  { %1048 = vsyncpa [#allocation16], 1 }
 0x539   :  { %1049 = vsyncpa [#allocation5], 1 }

</bundles_post_ra>
